<compile_context>
chip_gen: v6e
topology: v6e:2x2x1
jax: 0.10.0
libtpu: 0.0.40
codegen_flags: <defaults>
</compile_context>

<pallas_src>
import functools

import jax
import jax.numpy as jnp
import numpy as np
from jax.experimental import pallas as pl
from jax.experimental.pallas import tpu as pltpu


# ------------------------------- Pallas kernel ------------------------------ #

def decoder_loss_kernel(pred_ref, real_ref, out_ref, ce_acc, mask_acc, *, total_b):
    """One (core, batch-block) step of masked cross-entropy.

    pred_ref : (TB, V)    logits tile in native dtype (upcast in-kernel)
    real_ref : (TB, 1)    int32 target ids tile
    out_ref  : (1,1,128)  per-core partials: lane 0 = sum(CE), lane 1 = sum(mask)
    ce_acc   : (TB, 1)    f32 per-slot CE accumulator   (scratch, resident)
    mask_acc : (TB, 1)    f32 per-slot mask accumulator (scratch, resident)
    """
    c = pl.program_id(0)            # core-parallel axis (2-way)
    i = pl.program_id(1)            # batch-block reduction axis
    n_i = pl.num_programs(1)

    @pl.when(i == 0)
    def _init():
        ce_acc[...] = jnp.zeros_like(ce_acc)
        mask_acc[...] = jnp.zeros_like(mask_acc)

    pred = pred_ref[...].astype(jnp.float32)        # (TB, V) f32
    real = real_ref[...]                            # (TB, 1) i32
    tb, v = pred.shape

    # numerically stable log-softmax pieces (VPU/EUP + lane reductions, no MXU)
    row_max = jnp.max(pred, axis=-1, keepdims=True)                     # (TB, 1)
    shifted = pred - row_max                                            # (TB, V)
    lse = jnp.log(jnp.sum(jnp.exp(shifted), axis=-1, keepdims=True))    # (TB, 1)

    # pick shifted[r, real[r]] via one-hot compare + lane reduce (no gather / N=1 matmul)
    lane_ids = jax.lax.broadcasted_iota(jnp.int32, (tb, v), 1)
    picked = jnp.sum(jnp.where(lane_ids == real, shifted, 0.0),
                     axis=-1, keepdims=True)                            # (TB, 1)

    per_row = lse - picked                          # (TB,1) = -log_softmax[r, real[r]]
    mask = (real != 0).astype(jnp.float32)          # (TB, 1)

    # zero ragged-tail / overshoot rows (no host padding of pred, so the last block and the
    # second core's clamped blocks may contain garbage rows -> mask them before accumulating)
    blk = c * n_i + i                               # unclamped block id
    row_ids = blk * tb + jax.lax.broadcasted_iota(jnp.int32, (tb, 1), 0)
    valid = row_ids < total_b
    per_row = jnp.where(valid, per_row, 0.0)
    mask = jnp.where(valid, mask, 0.0)

    # elementwise per-slot accumulation; cross-sublane reduce deferred to finalize
    ce_acc[...] += per_row
    mask_acc[...] += mask

    @pl.when(i == n_i - 1)
    def _finalize():
        ce_tot = jnp.sum(ce_acc[...], axis=0, keepdims=True)[0, 0]
        mk_tot = jnp.sum(mask_acc[...], axis=0, keepdims=True)[0, 0]
        lane = jax.lax.broadcasted_iota(jnp.int32, out_ref.shape, 2)    # (1,1,128)
        out_ref[...] = jnp.where(lane == 0, ce_tot,
                                 jnp.where(lane == 1, mk_tot, 0.0))


# ------------------------------- host wrapper ------------------------------- #

def _round_up(x, m):
    return ((x + m - 1) // m) * m


def _pick_block_b(batch, vocab, itemsize, *, target_bytes=2 << 20, max_rows=2048):
    """Largest batch tile (multiple of 8) with ~target_bytes of native-dtype logits."""
    rows = target_bytes // max(1, vocab * itemsize)
    rows = max(8, min(int(rows), max_rows))
    rows = max(8, (rows // 8) * 8)
    # never exceed the (rounded-up) batch; prefer >=2 blocks so both v7x cores get work
    rows = min(rows, _round_up(batch, 8), max(8, _round_up(-(-batch // 2), 8)))
    return max(8, rows)


def decoder_loss(pred, real):
    """Faithful port of DecoderLoss.forward(real, pred) -> scalar loss."""
    B, V = pred.shape
    itemsize = jnp.dtype(pred.dtype).itemsize
    block_b = _pick_block_b(B, V, itemsize)
    nb = -(-B // block_b)            # number of real batch blocks
    n_i = -(-nb // 2)                # blocks per core (2-way core split)

    real_i = real.astype(jnp.int32).reshape(B, 1)

    def blk_map(c, i):
        # clamp so the second core's overshoot blocks stay in-range (their rows are masked)
        return (jnp.minimum(c * n_i + i, nb - 1), 0)

    kernel = functools.partial(decoder_loss_kernel, total_b=B)

    # VMEM budget: double-buffered native logits tile + f32 intermediates + accumulators
    tile_native = block_b * V * itemsize
    tile_f32 = block_b * V * 4
    vmem_need = 2 * tile_native + 6 * tile_f32 + 4 * block_b * 128 * 4 + (2 << 20)
    vmem_limit = int(min(max(vmem_need, 32 << 20), 64 << 20))

    parts = pl.pallas_call(
        kernel,
        out_shape=jax.ShapeDtypeStruct((2, 1, 128), jnp.float32),
        grid_spec=pltpu.PrefetchScalarGridSpec(
            num_scalar_prefetch=0,
            grid=(2, n_i),
            in_specs=[
                pl.BlockSpec((block_b, V), blk_map),    # lane-dense logits tile (native dtype)
                pl.BlockSpec((block_b, 1), blk_map),    # target ids tile
            ],
            out_specs=pl.BlockSpec((1, 1, 128), lambda c, i: (c, 0, 0)),
            scratch_shapes=[pltpu.VMEM((block_b, 1), jnp.float32),   # CE accumulator
                            pltpu.VMEM((block_b, 1), jnp.float32)],  # mask accumulator
        ),
        compiler_params=pltpu.CompilerParams(
            dimension_semantics=("parallel", "arbitrary"),
            vmem_limit_bytes=vmem_limit),
    )(pred, real_i)

    # combine the two per-core partials: loss = (sum CE / B) * sum(mask)
    ce_sum = parts[0, 0, 0] + parts[1, 0, 0]
    mask_sum = parts[0, 0, 1] + parts[1, 0, 1]
    return ce_sum * (1.0 / B) * mask_sum


# -------------------------------- pure-JAX ref ------------------------------ #

def decoder_loss_ref(pred, real):
    logp = jax.nn.log_softmax(pred.astype(jnp.float32), axis=-1)
    per = -jnp.take_along_axis(logp, real.astype(jnp.int32)[:, None], axis=-1)[:, 0]
    mean_ce = jnp.mean(per)                                  # CrossEntropyLoss (reduction='mean')
    mask = (real != 0).astype(jnp.float32)
    return mean_ce * jnp.sum(mask)                           # (loss * mask).sum()


# ------------------------------------ main ----------------------------------- #

if __name__ == "__main__":
    key = jax.random.PRNGKey(0)
    k1, k2, k3, k4 = jax.random.split(key, 4)

    # Case 1: small f32 (B=8, V=128), exact tile fit
    pred1 = jax.random.normal(k1, (8, 128), dtype=jnp.float32)
    real1 = jax.random.randint(k2, (8,), 0, 128, dtype=jnp.int32).at[0].set(0)
    out1 = jax.block_until_ready(decoder_loss(pred1, real1))
    ref1 = decoder_loss_ref(pred1, real1)
    np.testing.assert_allclose(np.asarray(out1), np.asarray(ref1), rtol=2e-4, atol=1e-4)
    assert out1.shape == ()

    # Case 2: ragged batch + bf16 logits (B=50, V=256) — exercises partial tiles,
    # in-kernel upcast and the 2-core block split
    pred2 = jax.random.normal(k3, (50, 256), dtype=jnp.float32).astype(jnp.bfloat16)
    real2 = jax.random.randint(k4, (50,), 0, 256, dtype=jnp.int32).at[3].set(0)
    out2 = jax.block_until_ready(decoder_loss(pred2, real2))
    ref2 = decoder_loss_ref(pred2, real2)
    np.testing.assert_allclose(np.asarray(out2), np.asarray(ref2), rtol=2e-4, atol=1e-4)

    print("KERNEL_OK")
</pallas_src>

<mosaic_0001>
module attributes {stable_mosaic.version = 11 : i64} {
  func.func @decoder_loss_kernel(%arg0: i32, %arg1: i32, %arg2: memref<8x128xf32, #tpu.memory_space<vmem>>, %arg3: memref<8x1xi32, #tpu.memory_space<vmem>>, %arg4: memref<1x1x128xf32, #tpu.memory_space<vmem>>, %arg5: memref<8x1xf32, #tpu.memory_space<vmem>>, %arg6: memref<8x1xf32, #tpu.memory_space<vmem>>) attributes {dimension_semantics = [#tpu.dimension_semantics<parallel>, #tpu.dimension_semantics<arbitrary>], iteration_bounds = array<i64: 2, 1>, scalar_prefetch = 0 : i64, scratch_operands = 2 : i64, tpu.core_type = #tpu.core_type<tc>, window_params = [{transform_indices = @transform_0, window_bounds = array<i64: 8, 128>}, {transform_indices = @transform_1, window_bounds = array<i64: 8, 1>}, {transform_indices = @transform_2, window_bounds = array<i64: 1, 1, 128>}]} {
    %c0_i32 = arith.constant 0 : i32
    %0 = arith.cmpi eq, %arg1, %c0_i32 : i32
    %1 = arith.extui %0 : i1 to i32
    %c0_i32_0 = arith.constant 0 : i32
    %2 = arith.cmpi ne, %1, %c0_i32_0 : i32
    scf.if %2 {
      %cst_21 = arith.constant 0.000000e+00 : f32
      %46 = vector.broadcast %cst_21 : f32 to vector<8x1xf32>
      %c0_22 = arith.constant 0 : index
      %c0_23 = arith.constant 0 : index
      %47 = vector.load %arg5[%c0_22, %c0_23] : memref<8x1xf32, #tpu.memory_space<vmem>>, vector<8x1xf32>
      tpu.vector_store %arg5[%c0_22, %c0_23], %46 {strides = array<i32>} : memref<8x1xf32, #tpu.memory_space<vmem>>, vector<8x1xf32>,
      %cst_24 = arith.constant 0.000000e+00 : f32
      %48 = vector.broadcast %cst_24 : f32 to vector<8x1xf32>
      %c0_25 = arith.constant 0 : index
      %c0_26 = arith.constant 0 : index
      %49 = vector.load %arg6[%c0_25, %c0_26] : memref<8x1xf32, #tpu.memory_space<vmem>>, vector<8x1xf32>
      tpu.vector_store %arg6[%c0_25, %c0_26], %48 {strides = array<i32>} : memref<8x1xf32, #tpu.memory_space<vmem>>, vector<8x1xf32>,
    } else {
    }
    %c0 = arith.constant 0 : index
    %c0_1 = arith.constant 0 : index
    %3 = vector.load %arg2[%c0, %c0_1] : memref<8x128xf32, #tpu.memory_space<vmem>>, vector<8x128xf32>
    %c0_2 = arith.constant 0 : index
    %c0_3 = arith.constant 0 : index
    %4 = vector.load %arg3[%c0_2, %c0_3] : memref<8x1xi32, #tpu.memory_space<vmem>>, vector<8x1xi32>
    %cst = arith.constant dense<0xFF800000> : vector<8xf32>
    %5 = vector.multi_reduction <maximumf>, %3, %cst [1] : vector<8x128xf32> to vector<8xf32>
    %6 = vector.shape_cast %5 : vector<8xf32> to vector<8x1xf32>
    %7 = vector.broadcast %6 : vector<8x1xf32> to vector<8x128xf32>
    %8 = arith.subf %3, %7 : vector<8x128xf32>
    %9 = math.exp %8 : vector<8x128xf32>
    %cst_4 = arith.constant dense<0.000000e+00> : vector<8xf32>
    %10 = vector.multi_reduction <add>, %9, %cst_4 [1] : vector<8x128xf32> to vector<8xf32>
    %11 = vector.shape_cast %10 : vector<8xf32> to vector<8x1xf32>
    %12 = math.log %11 : vector<8x1xf32>
    %13 = tpu.iota {dimensions = array<i32: 1>} : vector<8x128xi32>
    %14 = vector.broadcast %4 : vector<8x1xi32> to vector<8x128xi32>
    %15 = arith.cmpi eq, %13, %14 : vector<8x128xi32>
    %cst_5 = arith.constant 0.000000e+00 : f32
    %16 = vector.broadcast %cst_5 : f32 to vector<8x128xf32>
    %17 = arith.select %15, %8, %16 : vector<8x128xi1>, vector<8x128xf32>
    %cst_6 = arith.constant dense<0.000000e+00> : vector<8xf32>
    %18 = vector.multi_reduction <add>, %17, %cst_6 [1] : vector<8x128xf32> to vector<8xf32>
    %19 = vector.shape_cast %18 : vector<8xf32> to vector<8x1xf32>
    %20 = arith.subf %12, %19 : vector<8x1xf32>
    %c0_i32_7 = arith.constant 0 : i32
    %21 = vector.broadcast %c0_i32_7 : i32 to vector<8x1xi32>
    %22 = arith.cmpi ne, %4, %21 : vector<8x1xi32>
    %23 = arith.extui %22 : vector<8x1xi1> to vector<8x1xi32>
    %24 = arith.sitofp %23 : vector<8x1xi32> to vector<8x1xf32>
    %c1_i32 = arith.constant 1 : i32
    %25 = arith.muli %arg0, %c1_i32 : i32
    %26 = arith.addi %25, %arg1 : i32
    %c8_i32 = arith.constant 8 : i32
    %27 = arith.muli %26, %c8_i32 : i32
    %28 = tpu.iota {dimensions = array<i32: 0>} : vector<8x1xi32>
    %29 = vector.broadcast %27 : i32 to vector<8x1xi32>
    %30 = arith.addi %29, %28 : vector<8x1xi32>
    %c8_i32_8 = arith.constant 8 : i32
    %31 = vector.broadcast %c8_i32_8 : i32 to vector<8x1xi32>
    %32 = arith.cmpi slt, %30, %31 : vector<8x1xi32>
    %cst_9 = arith.constant 0.000000e+00 : f32
    %33 = vector.broadcast %cst_9 : f32 to vector<8x1xf32>
    %34 = arith.select %32, %20, %33 : vector<8x1xi1>, vector<8x1xf32>
    %cst_10 = arith.constant 0.000000e+00 : f32
    %35 = vector.broadcast %cst_10 : f32 to vector<8x1xf32>
    %36 = arith.select %32, %24, %35 : vector<8x1xi1>, vector<8x1xf32>
    %c0_11 = arith.constant 0 : index
    %c0_12 = arith.constant 0 : index
    %37 = vector.load %arg5[%c0_11, %c0_12] : memref<8x1xf32, #tpu.memory_space<vmem>>, vector<8x1xf32>
    %38 = arith.addf %37, %34 : vector<8x1xf32>
    %c0_13 = arith.constant 0 : index
    %c0_14 = arith.constant 0 : index
    %39 = vector.load %arg5[%c0_13, %c0_14] : memref<8x1xf32, #tpu.memory_space<vmem>>, vector<8x1xf32>
    tpu.vector_store %arg5[%c0_13, %c0_14], %38 {strides = array<i32>} : memref<8x1xf32, #tpu.memory_space<vmem>>, vector<8x1xf32>,
    %c0_15 = arith.constant 0 : index
    %c0_16 = arith.constant 0 : index
    %40 = vector.load %arg6[%c0_15, %c0_16] : memref<8x1xf32, #tpu.memory_space<vmem>>, vector<8x1xf32>
    %41 = arith.addf %40, %36 : vector<8x1xf32>
    %c0_17 = arith.constant 0 : index
    %c0_18 = arith.constant 0 : index
    %42 = vector.load %arg6[%c0_17, %c0_18] : memref<8x1xf32, #tpu.memory_space<vmem>>, vector<8x1xf32>
    tpu.vector_store %arg6[%c0_17, %c0_18], %41 {strides = array<i32>} : memref<8x1xf32, #tpu.memory_space<vmem>>, vector<8x1xf32>,
    %c0_i32_19 = arith.constant 0 : i32
    %43 = arith.cmpi eq, %arg1, %c0_i32_19 : i32
    %44 = arith.extui %43 : i1 to i32
    %c0_i32_20 = arith.constant 0 : i32
    %45 = arith.cmpi ne, %44, %c0_i32_20 : i32
    scf.if %45 {
      %c0_21 = arith.constant 0 : index
      %c0_22 = arith.constant 0 : index
      %46 = vector.load %arg5[%c0_21, %c0_22] : memref<8x1xf32, #tpu.memory_space<vmem>>, vector<8x1xf32>
      %cst_23 = arith.constant dense<0.000000e+00> : vector<1xf32>
      %47 = vector.multi_reduction <add>, %46, %cst_23 [0] : vector<8x1xf32> to vector<1xf32>
      %48 = vector.shape_cast %47 : vector<1xf32> to vector<1x1xf32>
      %49 = vector.extract %48[0, 0] : f32 from vector<1x1xf32>
      %c0_24 = arith.constant 0 : index
      %c0_25 = arith.constant 0 : index
      %50 = vector.load %arg6[%c0_24, %c0_25] : memref<8x1xf32, #tpu.memory_space<vmem>>, vector<8x1xf32>
      %cst_26 = arith.constant dense<0.000000e+00> : vector<1xf32>
      %51 = vector.multi_reduction <add>, %50, %cst_26 [0] : vector<8x1xf32> to vector<1xf32>
      %52 = vector.shape_cast %51 : vector<1xf32> to vector<1x1xf32>
      %53 = vector.extract %52[0, 0] : f32 from vector<1x1xf32>
      %54 = tpu.iota {dimensions = array<i32: 2>} : vector<1x1x128xi32>
      %c0_i32_27 = arith.constant 0 : i32
      %55 = vector.broadcast %c0_i32_27 : i32 to vector<1x1x128xi32>
      %56 = arith.cmpi eq, %54, %55 : vector<1x1x128xi32>
      %c1_i32_28 = arith.constant 1 : i32
      %57 = vector.broadcast %c1_i32_28 : i32 to vector<1x1x128xi32>
      %58 = arith.cmpi eq, %54, %57 : vector<1x1x128xi32>
      %cst_29 = arith.constant 0.000000e+00 : f32
      %59 = vector.broadcast %53 : f32 to vector<1x1x128xf32>
      %60 = vector.broadcast %cst_29 : f32 to vector<1x1x128xf32>
      %61 = arith.select %58, %59, %60 : vector<1x1x128xi1>, vector<1x1x128xf32>
      %62 = vector.broadcast %49 : f32 to vector<1x1x128xf32>
      %63 = arith.select %56, %62, %61 : vector<1x1x128xi1>, vector<1x1x128xf32>
      %c0_30 = arith.constant 0 : index
      %c0_31 = arith.constant 0 : index
      %c0_32 = arith.constant 0 : index
      %64 = vector.load %arg4[%c0_30, %c0_31, %c0_32] : memref<1x1x128xf32, #tpu.memory_space<vmem>>, vector<1x1x128xf32>
      tpu.vector_store %arg4[%c0_30, %c0_31, %c0_32], %63 {strides = array<i32>} : memref<1x1x128xf32, #tpu.memory_space<vmem>>, vector<1x1x128xf32>,
    } else {
    }
    return
  }
  func.func @transform_0(%arg0: i32, %arg1: i32) -> (i32, i32) {
    %c1_i32 = arith.constant 1 : i32
    %0 = arith.muli %arg0, %c1_i32 : i32
    %1 = arith.addi %0, %arg1 : i32
    %c0_i32 = arith.constant 0 : i32
    %2 = arith.minsi %1, %c0_i32 : i32
    %c0_i32_0 = arith.constant 0 : i32
    %c0_i32_1 = arith.constant 0 : i32
    return %2, %c0_i32_0 : i32, i32
  }
  func.func @transform_1(%arg0: i32, %arg1: i32) -> (i32, i32) {
    %c1_i32 = arith.constant 1 : i32
    %0 = arith.muli %arg0, %c1_i32 : i32
    %1 = arith.addi %0, %arg1 : i32
    %c0_i32 = arith.constant 0 : i32
    %2 = arith.minsi %1, %c0_i32 : i32
    %c0_i32_0 = arith.constant 0 : i32
    %c0_i32_1 = arith.constant 0 : i32
    return %2, %c0_i32_0 : i32, i32
  }
  func.func @transform_2(%arg0: i32, %arg1: i32) -> (i32, i32, i32) {
    %c0_i32 = arith.constant 0 : i32
    %c0_i32_0 = arith.constant 0 : i32
    %c0_i32_1 = arith.constant 0 : i32
    return %arg0, %c0_i32, %c0_i32_0 : i32, i32, i32
  }
}

</mosaic_0001>

<bundles_post_ra>
// kernel: tpu_custom_call.1
= control target key start
LH: loop header
LB: loop body
LE: loop exit
PB: predicated region body
PF: predicated region fallthrough
CT: control target
= control target key end

     0   :  { %7 = vsyncpa [#allocation5], 0  ;;  %s667_s0 = inlined_call_operand.vmem [shape: f32[8,128], index: 0, kind: input, shape index: {}]   ;;  %s668_s1 = inlined_call_operand.vmem [shape: s32[8,1], index: 1, kind: input, shape index: {}]   ;;  %s669_s2 = inlined_call_operand.hbm [shape: f32[2,1,128], index: 2, kind: output, shape index: {}]  }
   0x1   :  { %9 = vsyncpa [#allocation5 + $0x1], 0  ;;  %s552_s9 = smov 0   ;;  %s554_s10 = smov 0  }
   0x2   :  { %s556_s11 = smov 0   ;;  %s558_s12 = smov 0  }
   0x3   :  { %s560_s13 = smov 0   ;;  %s562_s14 = smov 0  }
   0x4 LB: > { %s372_s15 = sadd.s32 4294967295, %s532_s14   ;;  %s373_s16 = sadd.s32 4294967294, %s532_s14   ;;  %s532_s14 = sphi %s562_s14, %s15_s14   ;;  %s528_s13 = sphi %s560_s13, %s676_s13   ;;  %s524_s12 = sphi %s558_s12, %s675_s12   ;;  %s520_s11 = sphi %s556_s11, %s674_s11   ;;  %s516_s10 = sphi %s554_s10, %s673_s10   ;;  %s512_s9 = sphi %s552_s9, %s672_s9  }
   0x5   : > { %s27_s17 = sadd.s32 1, %s528_s13  ;;  %s98_s18 = sadd.s32 1, %s520_s11 }
   0x6   : > { %p29_p0 = scmp.ge.s32.totalorder %s27_s17, 2  ;;  %p108_p1 = scmp.ne.s32.totalorder %s520_s11, %s516_s10 }
   0x7   : > { %p109_p2 = scmp.eq.s32.totalorder %s372_s15, 1  ;;  %p114_p3 = scmp.ne.s32.totalorder %s516_s10, %s512_s9 }
   0x8   : > { %s678_s17 = smov (%p29_p0, %s27_s17), 0  ;;  %p115_p5 = scmp.eq.s32.totalorder %s373_s16, 1 }
   0x9   : > { %p592_p4 = por %p109_p2, %p108_p1  ;;  %s95_s20 = ssub.s32 %s528_s13, %s678_s17 }
   0xa   : > { %p376_p6 = scmp.ge.s32.totalorder %s532_s14, 1  ;;  %p96_p7 = scmp.eq.s32.totalorder %s95_s20, 0 }
   0xb   : > { %p599_p8 = por %p115_p5, %p114_p3  ;;  %p159_p9 = scmp.lt.s32.totalorder %s532_s14, 3 }
   0xc   : > { %s605_s22 = scalar_select %p96_p7, %s520_s11, %s98_s18  }
   0xd   : > { %p160_p10 = pnand %p376_p6, %p159_p9 }
   0xe   : > { %p190_p11 = scmp.lt.s32.totalorder (!%p160_p10), %s524_s12, 0  ;;  %s386_s3 = sshll.u32 (!%p160_p10), %s524_s12, 3 }
   0xf   : > { %163 = sbr.rel (%p160_p10) target bundleno = 429 (0x1ad), region = 28  ;;  %s187_s4 = sand.u32 (!%p160_p10), 1, %s516_s10  }
  0x10   : > { %s387_s5 = sshll.u32 (!%p160_p10), %s524_s12, 4  ;;  %s188_s7 = scalar_lea.vmem (!%p160_p10), [#allocation4], %s187_s4 }
  0x11   : > { %s297_s8 = sshll.u32 (!%p160_p10), %s188_s7, 4  ;;  %s627_s20 = scalar_lea.hbm (!%p160_p10), %s669_s2, %s387_s5  ;;  %s298_s8 = int_to_ptr.vmem [resolvable:$true] %s297_s8 }
  0x14   : > { %vm213_vm0 = vcmask 7168   ;;  %v534_v0 = vmov 0   ;;  %v535_v1 = vmov 0.0   ;;  %s191_s23 = scalar_select %p190_p11, %s524_s12, 0  ;;  %v227_v8 = vlaneseq }
  0x15   : > { %451 = vset.pattern.permute.xlu0 %v534_v0  ;;  %214 = vst.msk [vmem:[#allocation2] sm:$0xff] %vm213_vm0, %v535_v1  ;;  %215 = vst.msk [vmem:[#allocation3] sm:$0xff] %vm213_vm0, %v535_v1  ;;  %v244_v14 = vstv %s386_s3  ;;  %s456_s12 = scalar_lea.vmem %s298_s8, 16 }
  0x16   : > { %s680_s23 = smov (!%p190_p11, %s191_s23), 0  ;;  %v228_v9 = vand.u32 127, %v227_v8  ;;  %v243_v13 = vshrl.u32 %v227_v8, 7  ;;  %p457_p12 = scmp.ne.s32.totalorder %s298_s8, %s456_s12 }
  0x17   : > { %s380_s24 = sshll.u32 %s680_s23, 3  ;;  %s285_s23 = scalar_lea.sflag [#allocation5], %s187_s4 }
  0x18   : > { %s195_s27 = scalar_lea.vmem %s667_s0, %s380_s24  ;;  %s205_s30 = scalar_lea.vmem %s668_s1, %s380_s24  ;;  %v245_v15 = vadd.s32 %v244_v14, %v243_v13  ;;  %vm278_vm4 = vcmp.eq.s32.totalorder %v228_v9, 1  ;;  %vm277_vm5 = vcmp.eq.s32.totalorder %v228_v9, 0 }
  0x19   : > { %v216_v2 = vld [vmem:[%s195_s27] sm:$0xff]  ;;  %p458_p13 = pnand %p457_p12, %p592_p4  ;;  %s536_s24 = smov [#allocation4]  }
  0x1a   : > { %v217_v3 = vld [vmem:[%s205_s30] sm:$0xff]  ;;  %218 = vmax.xlane.f32.xlu0 %v216_v2  ;;  %vm246_vm3 = vcmp.lt.s32.totalorder %v245_v15, 8  ;;  %s460_s25 = sshll.u32 %s536_s24, 4  ;;  %s461_s25 = int_to_ptr.vmem [resolvable:$false] %s460_s25 }
  0x1b   : > { %vm237_vm1 = vcmp.ne.s32.totalorder %v217_v3, 0  ;;  %p459_p0 = pneg %p458_p13  ;;  %s462_s26 = scalar_lea.vmem %s461_s25, 32 }
  0x1c   : > { %v385_v4 = vsel %vm237_vm1, 1.0, %v535_v1  ;;  %v253_v16 = vld [vmem:[#allocation3] sm:$0xff]  ;;  %v249_v24 = vld [vmem:[#allocation2] sm:$0xff]  ;;  %p463_p1 = scmp.lt.s32.totalorder %s298_s8, %s461_s25  ;;  %p464_p2 = scmp.lt.s32.totalorder %s462_s26, %s456_s12 }
  0x1d   : > { %v248_v17 = vsel %vm246_vm3, %v385_v4, 0.0 }
  0x1e   : > { %v254_v18 = vadd.f32 %v253_v16, %v248_v17  ;;  %p465_p3 = por %p464_p2, %p463_p1 }
  0x20   : > { %255 = vst.msk [vmem:[#allocation3] sm:$0xff] %vm213_vm0, %v254_v18  ;;  %p466_p5 = pnand %p465_p3, %p459_p0 }
  0x27   : > { %v268_v21 = vld [vmem:[#allocation3] sm:$0xff] }
  0x28   : > { %v269_v26 = vsel %vm213_vm0, %v268_v21, 0.0 }
  0x29   : > { %v270_v29 = vrot.slane %v269_v26, 4 }
  0x2b   : > { %v271_v30 = vadd.f32 %v270_v29, %v269_v26 }
  0x2d   : > { %v272_v31 = vrot.slane %v271_v30, 2 }
  0x2f   : > { %v273_v35 = vadd.f32 %v272_v31, %v271_v30 }
  0x30   : > { %230 = vperm.xlu0 %451, %v217_v3  }
  0x31   : > { %v274_v38 = vrot.slane %v273_v35, 1 }
  0x33   : > { %v275_v41 = vadd.f32 %v274_v38, %v273_v35 }
  0xa3   : > { %v219_v5 = vpop.xlane.xlu0 %218 }
  0xa4   : > { %v220_v6 = vsub.f32 %v216_v2, %v219_v5 }
  0xa6   : > { %v221_v7 = vmul.f32 1.442695, %v220_v6 }
  0xa8   : > { %452 = vpow2.f32 %v221_v7 }
  0xab   : > { %v231_v10 = vpop.permute.xlu0 %230 }
  0xac   : > { %vm232_vm2 = vcmp.eq.s32.totalorder %v228_v9, %v231_v10 }
  0xad   : > { %v233_v12 = vsel %vm232_vm2, %v220_v6, 0.0 }
  0xb5   : > { %v453_v11 = vpop.eup %452 }
  0xb6   : > { %223 = vadd.xlane.f32.xlu1 %v453_v11 }
  0xba   : > { %234 = vadd.xlane.f32.xlu1 %v233_v12 }
 0x13f   : > { %v224_v19 = vpop.xlane.xlu1 %223 }
 0x140   : > { %454 = vlog2.f32 %v224_v19 }
 0x143   : > { %v235_v23 = vpop.xlane.xlu1 %234 }
 0x14d   : > { %v455_v20 = vpop.eup %454 }
 0x14e   : > { %v226_v22 = vmul.f32 0.6931472, %v455_v20 }
 0x150   : > { %v236_v25 = vsub.f32 %v226_v22, %v235_v23 }
 0x152   : > { %v247_v27 = vsel %vm246_vm3, %v236_v25, 0.0 }
 0x153   : > { %v250_v28 = vadd.f32 %v249_v24, %v247_v27 }
 0x155   : > { %252 = vst.msk [vmem:[#allocation2] sm:$0xff] %vm213_vm0, %v250_v28 }
 0x15c   : > { %v259_v32 = vld [vmem:[#allocation2] sm:$0xff] }
 0x15d   : > { %v260_v33 = vsel %vm213_vm0, %v259_v32, 0.0 }
 0x15e   : > { %v261_v34 = vrot.slane %v260_v33, 4 }
 0x160   : > { %v262_v36 = vadd.f32 %v261_v34, %v260_v33 }
 0x162   : > { %v263_v37 = vrot.slane %v262_v36, 2 }
 0x164   : > { %v264_v39 = vadd.f32 %v263_v37, %v262_v36 }
 0x166   : > { %v265_v40 = vrot.slane %v264_v39, 1 }
 0x168   : > { %v266_v42 = vadd.f32 %v265_v40, %v264_v39 }
 0x16a   : > { %390 = vpush %v266_v42 }
 0x16b   : > { %392 = vpush %v275_v41 }
 0x19b   : > { %s391_s6 = spop %390 }
 0x19c   : > { %v281_v43 = vstv %s391_s6  ;;  %s393_s15 = spop %392 }
 0x19d   : > { %v279_v44 = vstv %s393_s15 }
 0x19e   : > { %v280_v45 = vsel %vm278_vm4, %v279_v44, 0.0 }
 0x19f   : > { %v282_v46 = vsel %vm277_vm5, %v281_v43, %v280_v45 }
 0x1a0   : > { %283 = vst [vmem:[%s188_s7] sm:$0x1] %v282_v46 }
 0x1a1   : > { %469 = shalt.err (!%p466_p5)
}
 0x1a2   : > { %s470_s27 = scalar_lea.hbm %s627_s20, 16  ;;  %s474_s30 = scalar_lea.hbm %s669_s2, 32 }
 0x1a3   : > { %p471_p6 = scmp.ne.s32.totalorder %s627_s20, %s470_s27  ;;  %p475_p10 = scmp.lt.s32.totalorder %s627_s20, %s669_s2 }
 0x1a4   : > { %p476_p11 = scmp.lt.s32.totalorder %s474_s30, %s470_s27 }
 0x1a5   : > { %p472_p7 = pnand %p471_p6, %p592_p4 }
 0x1a6   : > { %p477_p12 = por %p476_p11, %p475_p10 }
 0x1a7   : > { %p473_p9 = pneg %p472_p7 }
 0x1a9   : > { %p478_p13 = pnand %p477_p12, %p473_p9 }
 0x1ab   : > { %481 = shalt.err (!%p478_p13)
}
 0x1ac   : > { %394 = dma.vmem_to_hbm [thread:$0]  (%p592_p4), %s298_s8, 16, %s627_s20, %s285_s23  }
 0x1ad PF: > { %p400_p0 = scmp.ge.s32.totalorder %s532_s14, 2  ;;  %s309_s5 = sand.u32 1, %s512_s9  }
 0x1ae   : > { %s310_s6 = scalar_lea.sflag [#allocation5], %s309_s5 }
 0x1af   : > { %p397_p1 = pnand %p400_p0, %p599_p8 }
 0x1b1   : > { %p398_p2 = pneg %p397_p1 }
 0x1b3   : > { %507 = dma.done.wait (%p398_p2), %s310_s6, 16  }
 0x1b4   : > { %509 = vsyncadd (%p398_p2), %s310_s6, 4294967280  ;;  %s15_s14 = sadd.s32 1, %s532_s14   ;;  %s672_s9 = smov %s516_s10 }
 0x1b5   : > { %p12_p3 = scmp.ge.s32.totalorder %s15_s14, 4   ;;  %s673_s10 = smov %s520_s11 }
 0x1b6   : > { %s674_s11 = smov %s605_s22  ;;  %s675_s12 = smov %s528_s13 }
 0x1b7   : > { %s676_s13 = smov %s678_s17  ;;  %14 = sbr.rel (!%p12_p3) target bundleno = 4 (0x4), region = 74 }
 0x1bc   :  { %314 = vsyncpa [#allocation5], 1 }
 0x1bd   :  { %316 = vsyncpa [#allocation5 + $0x1], 1 }

</bundles_post_ra>
